<compile_context>
chip_gen: v6e
topology: v6e:2x2x1
jax: 0.10.0
libtpu: 0.0.40
codegen_flags: <defaults>
</compile_context>

<pallas_src>
import jax
import jax.numpy as jnp
from jax.experimental import pallas as pl
from jax.experimental.pallas import tpu as pltpu

HIDDEN_SIZE = 50
INPUT_SIZE = 272
OUTPUT_SIZE = 1

LANE = 128  # TPU lane width; hidden/output dims are padded up to this


def make_rnn_kernel(seq_len: int, batch: int):
    """Single-invocation RNN forward. All operands are whole-array VMEM refs."""

    def rnn_kernel(x_ref, wih_ref, whh_ref, b_ref, wfc_ref, bfc_ref, out_ref):
        # Hoisted input projection for ALL timesteps in one MXU pass,
        # with the pre-summed bias (b_ih + b_hh) added once.
        xp = (jnp.dot(x_ref[...], wih_ref[...],
                      preferred_element_type=jnp.float32)
              + b_ref[...])                                   # (S*B, Hp)

        whh = whh_ref[...]                                    # (Hp, Hp)
        h = jnp.zeros((batch, whh.shape[1]), jnp.float32)     # h_0 = 0

        # Serial recurrence: the only work on the critical path is one small
        # (B, Hp) @ (Hp, Hp) matmul + tanh per timestep. Statically unrolled
        # (S is small here).
        # TODO(synk): for long sequences, stream xp via lax.fori_loop / a grid
        # axis instead of keeping it fully resident.
        for t in range(seq_len):
            h = jnp.tanh(xp[t * batch:(t + 1) * batch, :]
                         + jnp.dot(h, whh, preferred_element_type=jnp.float32))

        # Final FC on the last hidden state; output padded to a lane-dense
        # (B, 128) tile (wrapper slices back to (B, OUTPUT_SIZE)).
        out_ref[...] = (jnp.dot(h, wfc_ref[...],
                                preferred_element_type=jnp.float32)
                        + bfc_ref[...]).astype(out_ref.dtype)

    return rnn_kernel


def _round_up(n, m):
    return ((n + m - 1) // m) * m


def _pad2(a, shape):
    """Zero-pad a 2-D array up to `shape`."""
    return jnp.pad(a, [(0, s - d) for d, s in zip(a.shape, shape)])


def rnn_model_forward(x, params):
    """x: (B, S, I) float32 (PyTorch batch_first layout). Returns (B, OUTPUT_SIZE)."""
    B, S, I = x.shape
    H = params["w_hh"].shape[0]
    O = params["w_fc"].shape[0]

    HP = _round_up(H, LANE)   # padded hidden width (lane-dense)
    OP = _round_up(O, LANE)   # padded output width (lane-dense store)

    # Glue / layout prep (pure XLA, negligible):
    #  - seq-major + flatten (time, batch) so the input projection is ONE matmul
    #  - transpose weights to (in, out), pad hidden/output dims to 128 lanes
    #  - pre-sum the two RNN biases once
    x2d = jnp.transpose(x, (1, 0, 2)).reshape(S * B, I)                    # (S*B, I)
    w_ih_t = _pad2(jnp.transpose(params["w_ih"]), (I, HP))                 # (I, Hp)
    w_hh_t = _pad2(jnp.transpose(params["w_hh"]), (HP, HP))                # (Hp, Hp)
    b_sum = _pad2((params["b_ih"] + params["b_hh"]).reshape(1, H), (1, HP))  # (1, Hp)
    w_fc_t = _pad2(jnp.transpose(params["w_fc"]), (HP, OP))                # (Hp, Op)
    b_fc = _pad2(params["b_fc"].reshape(1, O), (1, OP))                    # (1, Op)

    # Padded lanes stay exactly zero through the recurrence:
    #   xp[:, H:] = 0 (zero W_ih cols / bias), W_hh rows/cols >= H are zero,
    #   so tanh(0 + 0) = 0 for the padded hidden lanes every step.

    kernel = make_rnn_kernel(S, B)

    out_pad = pl.pallas_call(
        kernel,
        out_shape=jax.ShapeDtypeStruct((B, OP), jnp.float32),
        # Single invocation, whole arrays resident in VMEM (total < 0.5 MiB).
        in_specs=[pl.BlockSpec(memory_space=pltpu.MemorySpace.VMEM)] * 6,
        out_specs=pl.BlockSpec(memory_space=pltpu.MemorySpace.VMEM),
    )(x2d, w_ih_t, w_hh_t, b_sum, w_fc_t, b_fc)

    return out_pad[:, :O]


def init_params(key, input_size, hidden_size, output_size):
    """Deterministic init mimicking PyTorch's U(-1/sqrt(H), 1/sqrt(H)) scheme."""
    ks = jax.random.split(key, 6)
    bound = 1.0 / jnp.sqrt(hidden_size)
    return {
        "w_ih": jax.random.uniform(ks[0], (hidden_size, input_size),
                                   jnp.float32, -bound, bound),
        "w_hh": jax.random.uniform(ks[1], (hidden_size, hidden_size),
                                   jnp.float32, -bound, bound),
        "b_ih": jax.random.uniform(ks[2], (hidden_size,),
                                   jnp.float32, -bound, bound),
        "b_hh": jax.random.uniform(ks[3], (hidden_size,),
                                   jnp.float32, -bound, bound),
        "w_fc": jax.random.uniform(ks[4], (output_size, hidden_size),
                                   jnp.float32, -bound, bound),
        "b_fc": jax.random.uniform(ks[5], (output_size,),
                                   jnp.float32, -bound, bound),
    }


def rnn_model_reference(x, params):
    """Pure-JAX reference of the PyTorch forward (lax.scan over time)."""
    B = x.shape[0]
    H = params["w_hh"].shape[0]

    def step(h, x_t):
        h_new = jnp.tanh(x_t @ params["w_ih"].T + params["b_ih"]
                         + h @ params["w_hh"].T + params["b_hh"])
        return h_new, None

    h0 = jnp.zeros((B, H), jnp.float32)
    h_last, _ = jax.lax.scan(step, h0, jnp.transpose(x, (1, 0, 2)))
    return h_last @ params["w_fc"].T + params["b_fc"]


if __name__ == "__main__":
    key = jax.random.PRNGKey(0)
    k_x, k_p = jax.random.split(key)

    batch, seq = 2, 8
    x = jax.random.normal(k_x, (batch, seq, INPUT_SIZE), jnp.float32)
    params = init_params(k_p, INPUT_SIZE, HIDDEN_SIZE, OUTPUT_SIZE)

    out = rnn_model_forward(x, params)
    out = jax.block_until_ready(out)

    ref = rnn_model_reference(x, params)
    assert out.shape == (batch, OUTPUT_SIZE)
    assert jnp.allclose(out, ref, atol=1e-4, rtol=1e-4)

    print("KERNEL_OK")
</pallas_src>

<mosaic_0001>
module attributes {stable_mosaic.version = 11 : i64} {
  func.func @rnn_kernel(%arg0: memref<16x272xf32, #tpu.memory_space<vmem>>, %arg1: memref<272x128xf32, #tpu.memory_space<vmem>>, %arg2: memref<128x128xf32, #tpu.memory_space<vmem>>, %arg3: memref<1x128xf32, #tpu.memory_space<vmem>>, %arg4: memref<128x128xf32, #tpu.memory_space<vmem>>, %arg5: memref<1x128xf32, #tpu.memory_space<vmem>>, %arg6: memref<2x128xf32, #tpu.memory_space<vmem>>) attributes {dimension_semantics = [], scalar_prefetch = 0 : i64, scratch_operands = 0 : i64, tpu.core_type = #tpu.core_type<tc>} {
    %c0 = arith.constant 0 : index
    %c0_0 = arith.constant 0 : index
    %0 = vector.load %arg0[%c0, %c0_0] : memref<16x272xf32, #tpu.memory_space<vmem>>, vector<16x272xf32>
    %c0_1 = arith.constant 0 : index
    %c0_2 = arith.constant 0 : index
    %1 = vector.load %arg1[%c0_1, %c0_2] : memref<272x128xf32, #tpu.memory_space<vmem>>, vector<272x128xf32>
    %cst = arith.constant dense<0.000000e+00> : vector<16x128xf32>
    %2 = tpu.matmul %0, %1, %cst {dimension_numbers = #tpu.dot_dimension_numbers<[1], [0], [0], [1], [0, 0, 1, 1], [], []>} : vector<16x272xf32>, vector<272x128xf32>, vector<16x128xf32> -> vector<16x128xf32>
    %c0_3 = arith.constant 0 : index
    %c0_4 = arith.constant 0 : index
    %3 = vector.load %arg3[%c0_3, %c0_4] : memref<1x128xf32, #tpu.memory_space<vmem>>, vector<1x128xf32>
    %4 = vector.broadcast %3 : vector<1x128xf32> to vector<16x128xf32>
    %5 = arith.addf %2, %4 : vector<16x128xf32>
    %c0_5 = arith.constant 0 : index
    %c0_6 = arith.constant 0 : index
    %6 = vector.load %arg2[%c0_5, %c0_6] : memref<128x128xf32, #tpu.memory_space<vmem>>, vector<128x128xf32>
    %cst_7 = arith.constant 0.000000e+00 : f32
    %7 = vector.broadcast %cst_7 : f32 to vector<2x128xf32>
    %8 = vector.extract_strided_slice %5 {offsets = [0, 0], sizes = [2, 128], strides = [1, 1]} : vector<16x128xf32> to vector<2x128xf32>
    %cst_8 = arith.constant dense<0.000000e+00> : vector<2x128xf32>
    %9 = tpu.matmul %7, %6, %cst_8 {dimension_numbers = #tpu.dot_dimension_numbers<[1], [0], [0], [1], [0, 0, 1, 1], [], []>} : vector<2x128xf32>, vector<128x128xf32>, vector<2x128xf32> -> vector<2x128xf32>
    %10 = arith.addf %8, %9 : vector<2x128xf32>
    %11 = math.tanh %10 : vector<2x128xf32>
    %12 = vector.extract_strided_slice %5 {offsets = [2, 0], sizes = [2, 128], strides = [1, 1]} : vector<16x128xf32> to vector<2x128xf32>
    %cst_9 = arith.constant dense<0.000000e+00> : vector<2x128xf32>
    %13 = tpu.matmul %11, %6, %cst_9 {dimension_numbers = #tpu.dot_dimension_numbers<[1], [0], [0], [1], [0, 0, 1, 1], [], []>} : vector<2x128xf32>, vector<128x128xf32>, vector<2x128xf32> -> vector<2x128xf32>
    %14 = arith.addf %12, %13 : vector<2x128xf32>
    %15 = math.tanh %14 : vector<2x128xf32>
    %16 = vector.extract_strided_slice %5 {offsets = [4, 0], sizes = [2, 128], strides = [1, 1]} : vector<16x128xf32> to vector<2x128xf32>
    %cst_10 = arith.constant dense<0.000000e+00> : vector<2x128xf32>
    %17 = tpu.matmul %15, %6, %cst_10 {dimension_numbers = #tpu.dot_dimension_numbers<[1], [0], [0], [1], [0, 0, 1, 1], [], []>} : vector<2x128xf32>, vector<128x128xf32>, vector<2x128xf32> -> vector<2x128xf32>
    %18 = arith.addf %16, %17 : vector<2x128xf32>
    %19 = math.tanh %18 : vector<2x128xf32>
    %20 = vector.extract_strided_slice %5 {offsets = [6, 0], sizes = [2, 128], strides = [1, 1]} : vector<16x128xf32> to vector<2x128xf32>
    %cst_11 = arith.constant dense<0.000000e+00> : vector<2x128xf32>
    %21 = tpu.matmul %19, %6, %cst_11 {dimension_numbers = #tpu.dot_dimension_numbers<[1], [0], [0], [1], [0, 0, 1, 1], [], []>} : vector<2x128xf32>, vector<128x128xf32>, vector<2x128xf32> -> vector<2x128xf32>
    %22 = arith.addf %20, %21 : vector<2x128xf32>
    %23 = math.tanh %22 : vector<2x128xf32>
    %24 = vector.extract_strided_slice %5 {offsets = [8, 0], sizes = [2, 128], strides = [1, 1]} : vector<16x128xf32> to vector<2x128xf32>
    %cst_12 = arith.constant dense<0.000000e+00> : vector<2x128xf32>
    %25 = tpu.matmul %23, %6, %cst_12 {dimension_numbers = #tpu.dot_dimension_numbers<[1], [0], [0], [1], [0, 0, 1, 1], [], []>} : vector<2x128xf32>, vector<128x128xf32>, vector<2x128xf32> -> vector<2x128xf32>
    %26 = arith.addf %24, %25 : vector<2x128xf32>
    %27 = math.tanh %26 : vector<2x128xf32>
    %28 = vector.extract_strided_slice %5 {offsets = [10, 0], sizes = [2, 128], strides = [1, 1]} : vector<16x128xf32> to vector<2x128xf32>
    %cst_13 = arith.constant dense<0.000000e+00> : vector<2x128xf32>
    %29 = tpu.matmul %27, %6, %cst_13 {dimension_numbers = #tpu.dot_dimension_numbers<[1], [0], [0], [1], [0, 0, 1, 1], [], []>} : vector<2x128xf32>, vector<128x128xf32>, vector<2x128xf32> -> vector<2x128xf32>
    %30 = arith.addf %28, %29 : vector<2x128xf32>
    %31 = math.tanh %30 : vector<2x128xf32>
    %32 = vector.extract_strided_slice %5 {offsets = [12, 0], sizes = [2, 128], strides = [1, 1]} : vector<16x128xf32> to vector<2x128xf32>
    %cst_14 = arith.constant dense<0.000000e+00> : vector<2x128xf32>
    %33 = tpu.matmul %31, %6, %cst_14 {dimension_numbers = #tpu.dot_dimension_numbers<[1], [0], [0], [1], [0, 0, 1, 1], [], []>} : vector<2x128xf32>, vector<128x128xf32>, vector<2x128xf32> -> vector<2x128xf32>
    %34 = arith.addf %32, %33 : vector<2x128xf32>
    %35 = math.tanh %34 : vector<2x128xf32>
    %36 = vector.extract_strided_slice %5 {offsets = [14, 0], sizes = [2, 128], strides = [1, 1]} : vector<16x128xf32> to vector<2x128xf32>
    %cst_15 = arith.constant dense<0.000000e+00> : vector<2x128xf32>
    %37 = tpu.matmul %35, %6, %cst_15 {dimension_numbers = #tpu.dot_dimension_numbers<[1], [0], [0], [1], [0, 0, 1, 1], [], []>} : vector<2x128xf32>, vector<128x128xf32>, vector<2x128xf32> -> vector<2x128xf32>
    %38 = arith.addf %36, %37 : vector<2x128xf32>
    %39 = math.tanh %38 : vector<2x128xf32>
    %c0_16 = arith.constant 0 : index
    %c0_17 = arith.constant 0 : index
    %40 = vector.load %arg4[%c0_16, %c0_17] : memref<128x128xf32, #tpu.memory_space<vmem>>, vector<128x128xf32>
    %cst_18 = arith.constant dense<0.000000e+00> : vector<2x128xf32>
    %41 = tpu.matmul %39, %40, %cst_18 {dimension_numbers = #tpu.dot_dimension_numbers<[1], [0], [0], [1], [0, 0, 1, 1], [], []>} : vector<2x128xf32>, vector<128x128xf32>, vector<2x128xf32> -> vector<2x128xf32>
    %c0_19 = arith.constant 0 : index
    %c0_20 = arith.constant 0 : index
    %42 = vector.load %arg5[%c0_19, %c0_20] : memref<1x128xf32, #tpu.memory_space<vmem>>, vector<1x128xf32>
    %43 = vector.broadcast %42 : vector<1x128xf32> to vector<2x128xf32>
    %44 = arith.addf %41, %43 : vector<2x128xf32>
    %c0_21 = arith.constant 0 : index
    %c0_22 = arith.constant 0 : index
    %45 = vector.load %arg6[%c0_21, %c0_22] : memref<2x128xf32, #tpu.memory_space<vmem>>, vector<2x128xf32>
    tpu.vector_store %arg6[%c0_21, %c0_22], %44 {strides = array<i32>} : memref<2x128xf32, #tpu.memory_space<vmem>>, vector<2x128xf32>,
    return
  }
}

</mosaic_0001>

<bundles_post_ra>
// kernel: tpu_custom_call.1
= control target key start
LH: loop header
LB: loop body
LE: loop exit
PB: predicated region body
PF: predicated region fallthrough
CT: control target
= control target key end

     0   :  { %11 = vsyncpa [#allocation3], 0  ;;  %s2091_s0 = inlined_call_operand.hbm [shape: f32[16,272], index: 0, kind: input, shape index: {}]   ;;  %s2092_s1 = inlined_call_operand.hbm [shape: f32[272,128], index: 1, kind: input, shape index: {}]   ;;  %s2093_s2 = inlined_call_operand.hbm [shape: f32[128,128], index: 2, kind: input, shape index: {}]   ;;  %s2094_s3 = inlined_call_operand.vmem [shape: f32[1,128], index: 3, kind: input, shape index: {}]   ;;  %s2095_s4 = inlined_call_operand.hbm [shape: f32[128,128], index: 4, kind: input, shape index: {}]   ;;  %s2096_s5 = inlined_call_operand.vmem [shape: f32[1,128], index: 5, kind: input, shape index: {}]   ;;  %s2097_s6 = inlined_call_operand.hbm [shape: f32[2,128], index: 6, kind: output, shape index: {}]  }
   0x1   :  { %12 = vsyncpa [#allocation6], 0 }
   0x2   :  { %13 = vsyncpa [#allocation9], 0 }
   0x3   :  { %14 = vsyncpa [#allocation4], 0  ;;  %s1678_s21 = smov [#allocation5]  }
   0x4   :  { %s32_s22 = sshll.u32 %s1678_s21, 4  ;;  %s33_s22 = int_to_ptr.vmem [resolvable:$true] %s32_s22 }
   0x5   :  { %s1578_s23 = scalar_lea.vmem %s33_s22, 4352  ;;  %p1583_p1 = scmp.lt.s32.totalorder %s33_s22, %s33_s22 }
   0x6   :  { %p1579_p0 = scmp.ne.s32.totalorder %s33_s22, %s1578_s23  ;;  %p1584_p2 = scmp.lt.s32.totalorder %s1578_s23, %s1578_s23 }
   0x8   :  { %p1585_p3 = por %p1584_p2, %p1583_p1 }
   0xa   :  { %p1586_p4 = pnand %p1585_p3, %p1579_p0 }
   0xc   :  { %1589 = shalt.err (!%p1586_p4)
}
   0xd   :  { %s1679_s24 = smov 128   ;;  %s1680_s25 = smov 8  }
   0xe   :  { %38 = dma.hbm_to_vmem [thread:$0]  %s2092_s1, 4352, %s33_s22, [#allocation6], %s1679_s24, %s1679_s24, %s1680_s25  }
   0xf   :  { %s1681_s28 = smov [#allocation2]  }
  0x10   :  { %s20_s29 = sshll.u32 %s1681_s28, 4  ;;  %s21_s29 = int_to_ptr.vmem [resolvable:$true] %s20_s29 }
  0x11   :  { %s1598_s30 = scalar_lea.vmem %s21_s29, 768  ;;  %p1603_p6 = scmp.lt.s32.totalorder %s21_s29, %s21_s29 }
  0x12   :  { %p1599_p5 = scmp.ne.s32.totalorder %s21_s29, %s1598_s30  ;;  %p1604_p7 = scmp.lt.s32.totalorder %s1598_s30, %s1598_s30 }
  0x14   :  { %p1605_p8 = por %p1604_p7, %p1603_p6 }
  0x16   :  { %p1606_p9 = pnand %p1605_p8, %p1599_p5 }
  0x18   :  { %1609 = shalt.err (!%p1606_p9)
}
  0x19   :  { %s1682_s7 = smov 384   ;;  %s1683_s8 = smov 24  }
  0x1a   :  { %26 = dma.hbm_to_vmem [thread:$0]  %s2091_s0, 768, %s21_s29, [#allocation3], %s1682_s7, %s1682_s7, %s1683_s8  }
  0x1b   :  { %s1684_s11 = smov [#allocation7]   ;;  %s1685_s13 = smov [#allocation8]  }
  0x1c   :  { %s44_s12 = sshll.u32 %s1684_s11, 4  ;;  %s58_s1 = sshll.u32 %s1685_s13, 4  ;;  %s45_s12 = int_to_ptr.vmem [resolvable:$true] %s44_s12  ;;  %s59_s1 = int_to_ptr.vmem [resolvable:$true] %s58_s1 }
  0x1d   :  { %s1618_s14 = scalar_lea.vmem %s45_s12, 2048  ;;  %p1623_p11 = scmp.lt.s32.totalorder %s45_s12, %s45_s12 }
  0x1e   :  { %p1619_p10 = scmp.ne.s32.totalorder %s45_s12, %s1618_s14  ;;  %p1624_p12 = scmp.lt.s32.totalorder %s1618_s14, %s1618_s14 }
  0x20   :  { %p1625_p13 = por %p1624_p12, %p1623_p11 }
  0x22   :  { %p1626_p0 = pnand %p1625_p13, %p1619_p10 }
  0x24   :  { %1629 = shalt.err (!%p1626_p0)
}
  0x25   :  { %50 = dma.hbm_to_vmem [thread:$0]  %s2093_s2, 2048, %s45_s12, [#allocation6], %s1679_s24, %s1679_s24, %s1680_s25  }
  0x26   :  { %s1638_s0 = scalar_lea.vmem %s59_s1, 2048  ;;  %p1643_p2 = scmp.lt.s32.totalorder %s59_s1, %s59_s1 }
  0x27   :  { %p1639_p1 = scmp.ne.s32.totalorder %s59_s1, %s1638_s0  ;;  %p1644_p3 = scmp.lt.s32.totalorder %s1638_s0, %s1638_s0 }
  0x29   :  { %p1645_p4 = por %p1644_p3, %p1643_p2 }
  0x2b   :  { %p1646_p5 = pnand %p1645_p4, %p1639_p1 }
  0x2d   :  { %1649 = shalt.err (!%p1646_p5)
}
  0x2e   :  { %64 = dma.hbm_to_vmem [thread:$0]  %s2095_s4, 2048, %s59_s1, [#allocation9], %s1679_s24, %s1679_s24, %s1680_s25  }
  0x2f   :  { %1670 = dma.done.wait [#allocation3], 768  }
  0x30   :  { %1671 = vsyncadd [#allocation3], 4294966528 }
  0x31   :  { %1672 = dma.done.wait [#allocation6], 6400  }
  0x32   :  { %1673 = vsyncadd [#allocation6], 4294960896 }
  0x33   :  { %1674 = dma.done.wait [#allocation9], 2048  }
  0x34   :  { %1675 = vsyncadd [#allocation9], 4294965248  ;;  %v116_v0 = vld [vmem:[#allocation5 + $0xf8] sm:$0xff]  ;;  %v115_v2 = vld [vmem:[#allocation5 + $0xf0] sm:$0xff]  ;;  %vm126_vm0 = vcmask 130048   ;;  %v1686_v14 = vmov 0.0  }
  0x35   :  { %v100_v1 = vld [vmem:[#allocation5 + $0x78] sm:$0xff]  ;;  %1026 = vmatprep.subr.mxu0 %v116_v0  ;;  %v118_v3 = vld [vmem:[#allocation5 + $0x108] sm:$0xff]  ;;  %v99_v4 = vld [vmem:[#allocation5 + $0x70] sm:$0xff]  ;;  %vm1687_vm1 = vmmov 0   ;;  %s1688_s20 = smov [#allocation10]  }
  0x36   :  { %1027 = vmatpush3.msra.mxu0 %v100_v1  ;;  %1221 = vmatprep.subr.mxu1 %v118_v3  ;;  %v114_v5 = vld [vmem:[#allocation5 + $0xe8] sm:$0xff]  ;;  %v117_v6 = vld [vmem:[#allocation5 + $0x100] sm:$0xff]  ;;  %v84_v11 = vld [vmem:[#allocation2 + $0x28] sm:$0xff]  ;;  %s1011_s21 = sshll.u32 %s1688_s20, 4  ;;  %s1012_s21 = int_to_ptr.vmem [resolvable:$true] %s1011_s21 }
  0x37   :  { %1028 = vmatprep.subr.mxu0 %v115_v2  ;;  %1222 = vmatpush3.msra.mxu1 %v118_v3  ;;  %v98_v7 = vld [vmem:[#allocation5 + $0x68] sm:$0xff]  ;;  %v81_v8 = vld [vmem:[#allocation2 + $0x10] sm:$0xff]  ;;  %v112_v13 = vld [vmem:[#allocation5 + $0xd8] sm:$0xff]  ;;  %s1650_s22 = scalar_lea.vmem %s1012_s21, 32  ;;  %p1655_p7 = scmp.lt.s32.totalorder %s1012_s21, %s1012_s21 }
  0x38   :  { %1029 = vmatpush3.msra.mxu0 %v99_v4  ;;  %1223 = vmatprep.subr.mxu1 %v117_v6  ;;  %v113_v9 = vld [vmem:[#allocation5 + $0xe0] sm:$0xff]  ;;  %v1746_v12 = vld [vmem:[#allocation7 + $0x78] sm:$0xff]  ;;  %v96_v15 = vld [vmem:[#allocation5 + $0x58] sm:$0xff]  ;;  %p1651_p6 = scmp.ne.s32.totalorder %s1012_s21, %s1650_s22  ;;  %p1656_p8 = scmp.lt.s32.totalorder %s1650_s22, %s1650_s22 }
  0x39   :  { %1030 = vmatprep.subr.mxu0 %v114_v5  ;;  %1224 = vmatpush3.msra.mxu1 %v117_v6  ;;  %v97_v10 = vld [vmem:[#allocation5 + $0x60] sm:$0xff]  ;;  %v111_v17 = vld [vmem:[#allocation5 + $0xd0] sm:$0xff]  ;;  %v1754_v19 = vld [vmem:[#allocation7 + $0x68] sm:$0xff] }
  0x3a   :  { %1031 = vmatpush3.msra.mxu0 %v98_v7  ;;  %1225 = vmatprep.mubr.msk.f32.mxu1 %vm126_vm0, %v81_v8  ;;  %v1750_v16 = vld [vmem:[#allocation7 + $0x70] sm:$0xff]  ;;  %v95_v18 = vld [vmem:[#allocation5 + $0x50] sm:$0xff]  ;;  %v110_v20 = vld [vmem:[#allocation5 + $0xc8] sm:$0xff]  ;;  %p1657_p9 = por %p1656_p8, %p1655_p7 }
  0x3b   :  { %1032 = vmatprep.subr.mxu0 %v113_v9  ;;  %1228 = vmatprep.subr.mxu1 %v1686_v14  ;;  %v94_v21 = vld [vmem:[#allocation5 + $0x48] sm:$0xff]  ;;  %v1758_v22 = vld [vmem:[#allocation7 + $0x60] sm:$0xff]  ;;  %v109_v23 = vld [vmem:[#allocation5 + $0xc0] sm:$0xff] }
  0x3c   :  { %1033 = vmatpush3.msra.mxu0 %v97_v10  ;;  %1226 = vmatmul.mubr.msk.f32.vlgmr.msra.gmra.mxu1 %vm126_vm0, %v84_v11  ;;  %v93_v24 = vld [vmem:[#allocation5 + $0x40] sm:$0xff]  ;;  %v1762_v25 = vld [vmem:[#allocation7 + $0x58] sm:$0xff]  ;;  %v108_v26 = vld [vmem:[#allocation5 + $0xb8] sm:$0xff]  ;;  %p1658_p10 = pnand %p1657_p9, %p1651_p6 }
  0x3d   :  { %1229 = vmatpush3.msra.mxu1 %v1746_v12  ;;  %1034 = vmatprep.subr.mxu0 %v112_v13  ;;  %v92_v27 = vld [vmem:[#allocation5 + $0x38] sm:$0xff]  ;;  %v1766_v28 = vld [vmem:[#allocation7 + $0x50] sm:$0xff]  ;;  %v107_v29 = vld [vmem:[#allocation5 + $0xb0] sm:$0xff] }
  0x3e   :  { %1230 = vmatprep.subr.mxu1 %v1686_v14  ;;  %1035 = vmatpush3.msra.mxu0 %v96_v15  ;;  %v91_v30 = vld [vmem:[#allocation5 + $0x30] sm:$0xff]  ;;  %v1770_v31 = vld [vmem:[#allocation7 + $0x48] sm:$0xff]  ;;  %v106_v32 = vld [vmem:[#allocation5 + $0xa8] sm:$0xff] }
  0x3f   :  { %1231 = vmatpush3.msra.mxu1 %v1750_v16  ;;  %1036 = vmatprep.subr.mxu0 %v111_v17  ;;  %v90_v33 = vld [vmem:[#allocation5 + $0x28] sm:$0xff]  ;;  %v1774_v34 = vld [vmem:[#allocation7 + $0x40] sm:$0xff]  ;;  %v105_v35 = vld [vmem:[#allocation5 + $0xa0] sm:$0xff] }
  0x40   :  { %1232 = vmatprep.subr.mxu1 %v1686_v14  ;;  %1037 = vmatpush3.msra.mxu0 %v95_v18  ;;  %v89_v36 = vld [vmem:[#allocation5 + $0x20] sm:$0xff]  ;;  %v1778_v37 = vld [vmem:[#allocation7 + $0x38] sm:$0xff]  ;;  %v104_v38 = vld [vmem:[#allocation5 + $0x98] sm:$0xff] }
  0x41   :  { %1233 = vmatpush3.msra.mxu1 %v1754_v19  ;;  %1038 = vmatprep.subr.mxu0 %v110_v20  ;;  %v88_v39 = vld [vmem:[#allocation5 + $0x18] sm:$0xff]  ;;  %v1782_v40 = vld [vmem:[#allocation7 + $0x30] sm:$0xff]  ;;  %v103_v41 = vld [vmem:[#allocation5 + $0x90] sm:$0xff] }
  0x42   :  { %1234 = vmatprep.subr.mxu1 %v1686_v14  ;;  %1039 = vmatpush3.msra.mxu0 %v94_v21  ;;  %v87_v42 = vld [vmem:[#allocation5 + $0x10] sm:$0xff]  ;;  %v1786_v43 = vld [vmem:[#allocation7 + $0x28] sm:$0xff]  ;;  %v102_v44 = vld [vmem:[#allocation5 + $0x88] sm:$0xff] }
  0x43   :  { %1235 = vmatpush3.msra.mxu1 %v1758_v22  ;;  %1040 = vmatprep.subr.mxu0 %v109_v23  ;;  %v86_v45 = vld [vmem:[#allocation5 + $0x8] sm:$0xff]  ;;  %v1790_v46 = vld [vmem:[#allocation7 + $0x20] sm:$0xff]  ;;  %v101_v47 = vld [vmem:[#allocation5 + $0x80] sm:$0xff] }
  0x44   :  { %1236 = vmatprep.subr.mxu1 %v1686_v14  ;;  %1041 = vmatpush3.msra.mxu0 %v93_v24  ;;  %v85_v48 = vld [vmem:[#allocation5] sm:$0xff]  ;;  %v80_v49 = vld [vmem:[#allocation2 + $0x8] sm:$0xff]  ;;  %v1794_v50 = vld [vmem:[#allocation7 + $0x18] sm:$0xff] }
  0x45   :  { %1237 = vmatpush3.msra.mxu1 %v1762_v25  ;;  %1042 = vmatprep.subr.mxu0 %v108_v26  ;;  %v79_v51 = vld [vmem:[#allocation2] sm:$0xff]  ;;  %v1798_v52 = vld [vmem:[#allocation7 + $0x10] sm:$0xff]  ;;  %v1802_v54 = vld [vmem:[#allocation7 + $0x8] sm:$0xff] }
  0x46   :  { %1238 = vmatprep.subr.mxu1 %v1686_v14  ;;  %1043 = vmatpush3.msra.mxu0 %v92_v27  ;;  %v83_v53 = vld [vmem:[#allocation2 + $0x20] sm:$0xff]  ;;  %v82_v55 = vld [vmem:[#allocation2 + $0x18] sm:$0xff] }
  0x47   :  { %1239 = vmatpush3.msra.mxu1 %v1766_v28  ;;  %1044 = vmatprep.subr.mxu0 %v107_v29  ;;  %v1806_v56 = vld [vmem:[#allocation7] sm:$0xff] }
  0x48   :  { %1240 = vmatprep.subr.mxu1 %v1686_v14  ;;  %1045 = vmatpush3.msra.mxu0 %v91_v30  ;;  %v1022_v59 = vld [vmem:[%s2094_s3] ss:$0 sm:$0xff] }
  0x49   :  { %1241 = vmatpush3.msra.mxu1 %v1770_v31  ;;  %1046 = vmatprep.subr.mxu0 %v106_v32 }
  0x4a   :  { %1242 = vmatprep.subr.mxu1 %v1686_v14  ;;  %1047 = vmatpush3.msra.mxu0 %v90_v33 }
  0x4b   :  { %1243 = vmatpush3.msra.mxu1 %v1774_v34  ;;  %1048 = vmatprep.subr.mxu0 %v105_v35 }
  0x4c   :  { %1244 = vmatprep.subr.mxu1 %v1686_v14  ;;  %1049 = vmatpush3.msra.mxu0 %v89_v36 }
  0x4d   :  { %1245 = vmatpush3.msra.mxu1 %v1778_v37  ;;  %1050 = vmatprep.subr.mxu0 %v104_v38 }
  0x4e   :  { %1246 = vmatprep.subr.mxu1 %v1686_v14  ;;  %1051 = vmatpush3.msra.mxu0 %v88_v39 }
  0x4f   :  { %1247 = vmatpush3.msra.mxu1 %v1782_v40  ;;  %1052 = vmatprep.subr.mxu0 %v103_v41 }
  0x50   :  { %1248 = vmatprep.subr.mxu1 %v1686_v14  ;;  %1053 = vmatpush3.msra.mxu0 %v87_v42 }
  0x51   :  { %1249 = vmatpush3.msra.mxu1 %v1786_v43  ;;  %1054 = vmatprep.subr.mxu0 %v102_v44 }
  0x52   :  { %1250 = vmatprep.subr.mxu1 %v1686_v14  ;;  %1055 = vmatpush3.msra.mxu0 %v86_v45 }
  0x53   :  { %1251 = vmatpush3.msra.mxu1 %v1790_v46  ;;  %1056 = vmatprep.subr.mxu0 %v101_v47 }
  0x54   :  { %1252 = vmatprep.subr.mxu1 %v1686_v14  ;;  %1057 = vmatpush3.msra.mxu0 %v85_v48 }
  0x55   :  { %197 = vmatprep.mubr.f32.mxu0 %v80_v49  ;;  %1253 = vmatpush3.msra.mxu1 %v1794_v50 }
  0x56   :  { %198 = vmatmul.mubr.f32.vlgmr.msra.gmra.mxu0 %v79_v51  ;;  %1254 = vmatprep.subr.mxu1 %v1686_v14  ;;  %v917_v51 = vld [vmem:[#allocation8 + $0x48] sm:$0xff] }
  0x57   :  { %1255 = vmatpush3.msra.mxu1 %v1798_v52  ;;  %202 = vmatprep.mubr.f32.mxu0 %v83_v53  ;;  %v915_v53 = vld [vmem:[#allocation8 + $0x38] sm:$0xff] }
  0x58   :  { %1256 = vmatprep.subr.mxu1 %v1686_v14  ;;  %1260 = vmatprep.mubr.msk.f32.mxu1 %vm1687_vm1, %v1686_v14 }
  0x59   :  { %1257 = vmatpush3.msra.mxu1 %v1802_v54  ;;  %1263 = vmatprep.subr.mxu0 %v1686_v14 }
  0x5a   :  { %203 = vmatmul.mubr.f32.gmra.mxu0 %v82_v55  ;;  %1258 = vmatprep.subr.mxu1 %v1686_v14  ;;  %v913_v55 = vld [vmem:[#allocation8 + $0x28] sm:$0xff] }
  0x5b   :  { %1259 = vmatpush3.msra.mxu1 %v1806_v56  ;;  %1264 = vmatpush3.msra.mxu0 %v1746_v12 }
  0x5c   :  { %1261 = vmatmul.mubr.f32.vlgmr.msra.gmra.mxu1 %v1686_v14  ;;  %1265 = vmatprep.subr.mxu0 %v1686_v14 }
  0x5d   :  { %1266 = vmatpush3.msra.mxu0 %v1750_v16  ;;  %1295 = vmatprep.mubr.msk.f32.mxu0 %vm1687_vm1, %v1686_v14 }
  0x5e   :  { %1267 = vmatprep.subr.mxu0 %v1686_v14  ;;  %1298 = vmatprep.subr.mxu1 %v1686_v14 }
  0x5f   :  { %1268 = vmatpush3.msra.mxu0 %v1754_v19  ;;  %1299 = vmatpush3.msra.mxu1 %v1746_v12 }
  0x60   :  { %1269 = vmatprep.subr.mxu0 %v1686_v14  ;;  %1300 = vmatprep.subr.mxu1 %v1686_v14 }
  0x61   :  { %1270 = vmatpush3.msra.mxu0 %v1758_v22  ;;  %1301 = vmatpush3.msra.mxu1 %v1750_v16 }
  0x62   :  { %1271 = vmatprep.subr.mxu0 %v1686_v14  ;;  %1302 = vmatprep.subr.mxu1 %v1686_v14 }
  0x63   :  { %1272 = vmatpush3.msra.mxu0 %v1762_v25  ;;  %1303 = vmatpush3.msra.mxu1 %v1754_v19 }
  0x64   :  { %1273 = vmatprep.subr.mxu0 %v1686_v14  ;;  %1304 = vmatprep.subr.mxu1 %v1686_v14 }
  0x65   :  { %1274 = vmatpush3.msra.mxu0 %v1766_v28  ;;  %1305 = vmatpush3.msra.mxu1 %v1758_v22 }
  0x66   :  { %1275 = vmatprep.subr.mxu0 %v1686_v14  ;;  %1306 = vmatprep.subr.mxu1 %v1686_v14 }
  0x67   :  { %1276 = vmatpush3.msra.mxu0 %v1770_v31  ;;  %1307 = vmatpush3.msra.mxu1 %v1762_v25 }
  0x68   :  { %1277 = vmatprep.subr.mxu0 %v1686_v14  ;;  %1308 = vmatprep.subr.mxu1 %v1686_v14 }
  0x69   :  { %1278 = vmatpush3.msra.mxu0 %v1774_v34  ;;  %1309 = vmatpush3.msra.mxu1 %v1766_v28 }
  0x6a   :  { %1279 = vmatprep.subr.mxu0 %v1686_v14  ;;  %1310 = vmatprep.subr.mxu1 %v1686_v14 }
  0x6b   :  { %1280 = vmatpush3.msra.mxu0 %v1778_v37  ;;  %1311 = vmatpush3.msra.mxu1 %v1770_v31 }
  0x6c   :  { %1281 = vmatprep.subr.mxu0 %v1686_v14  ;;  %1312 = vmatprep.subr.mxu1 %v1686_v14 }
  0x6d   :  { %1282 = vmatpush3.msra.mxu0 %v1782_v40  ;;  %1313 = vmatpush3.msra.mxu1 %v1774_v34 }
  0x6e   :  { %1283 = vmatprep.subr.mxu0 %v1686_v14  ;;  %1314 = vmatprep.subr.mxu1 %v1686_v14 }
  0x6f   :  { %1284 = vmatpush3.msra.mxu0 %v1786_v43  ;;  %1315 = vmatpush3.msra.mxu1 %v1778_v37 }
  0x70   :  { %1285 = vmatprep.subr.mxu0 %v1686_v14  ;;  %1316 = vmatprep.subr.mxu1 %v1686_v14 }
  0x71   :  { %1286 = vmatpush3.msra.mxu0 %v1790_v46  ;;  %1317 = vmatpush3.msra.mxu1 %v1782_v40 }
  0x72   :  { %1287 = vmatprep.subr.mxu0 %v1686_v14  ;;  %1318 = vmatprep.subr.mxu1 %v1686_v14 }
  0x73   :  { %1288 = vmatpush3.msra.mxu0 %v1794_v50  ;;  %1319 = vmatpush3.msra.mxu1 %v1786_v43 }
  0x74   :  { %1289 = vmatprep.subr.mxu0 %v1686_v14  ;;  %1320 = vmatprep.subr.mxu1 %v1686_v14 }
  0x75   :  { %1290 = vmatpush3.msra.mxu0 %v1798_v52  ;;  %1321 = vmatpush3.msra.mxu1 %v1790_v46 }
  0x76   :  { %1291 = vmatprep.subr.mxu0 %v1686_v14  ;;  %1322 = vmatprep.subr.mxu1 %v1686_v14 }
  0x77   :  { %1292 = vmatpush3.msra.mxu0 %v1802_v54  ;;  %1323 = vmatpush3.msra.mxu1 %v1794_v50 }
  0x78   :  { %1293 = vmatprep.subr.mxu0 %v1686_v14  ;;  %1324 = vmatprep.subr.mxu1 %v1686_v14 }
  0x79   :  { %1294 = vmatpush3.msra.mxu0 %v1806_v56  ;;  %1325 = vmatpush3.msra.mxu1 %v1798_v52 }
  0x7a   :  { %1326 = vmatprep.subr.mxu1 %v1686_v14  ;;  %1330 = vmatprep.mubr.msk.f32.mxu1 %vm1687_vm1, %v1686_v14 }
  0x7b   :  { %1327 = vmatpush3.msra.mxu1 %v1802_v54  ;;  %1333 = vmatprep.subr.mxu0 %v1686_v14 }
  0x7c   :  { %1328 = vmatprep.subr.mxu1 %v1686_v14 }
  0x7d   :  { %1329 = vmatpush3.msra.mxu1 %v1806_v56 }
  0x7e   :  { %1368 = vmatprep.subr.mxu1 %v1686_v14 }
  0xfc   :  { %v1227_v57 = vpop.f32.mrf.mxu1 }
  0xfe   :  { %v274_v62 = vpop.f32.mrf.mxu1 }
 0x116   :  { %v1058_v58 = vpop.f32.mrf.mxu0 }
 0x118   :  { %v1059_v60 = vpop.f32.mrf.mxu0 }
 0x119   :  { %v1060_v61 = vadd.f32 %v1059_v60, %v1058_v58  ;;  %v910_v58 = vld [vmem:[#allocation8 + $0x10] sm:$0xff]  ;;  %v908_v60 = vld [vmem:[#allocation8] sm:$0xff] }
 0x11a   :  { %v1061_v63 = vpop.f32.mrf.mxu0 }
 0x11b   :  { %v200_v0 = vadd.f32 %v1060_v61, %v1022_v59 }
 0x11c   :  { %v1062_v1 = vpop.f32.mrf.mxu0  ;;  %v365_v2 = vpop.f32.mrf.mxu1 }
 0x11d   :  { %v1887_v3 = vadd.f32 %v274_v62, %v200_v0  ;;  %v1063_v4 = vadd.f32 %v1062_v1, %v1061_v63 }
 0x11e   :  { %v1262_v5 = vpop.f32.mrf.mxu1 }
 0x11f   :  { %v205_v6 = vadd.f32 %v1063_v4, %v1022_v59  ;;  %v369_v7 = vadd.f32 %v365_v2, %v1887_v3  ;;  %v909_v59 = vld [vmem:[#allocation8 + $0x8] sm:$0xff] }
 0x121   :  { %v1890_v8 = vadd.f32 %v1227_v57, %v205_v6  ;;  %1554 = vtanh.f32 %v369_v7  ;;  %v911_v57 = vld [vmem:[#allocation8 + $0x18] sm:$0xff] }
 0x12e   :  { %v1555_v9 = vpop.eup %1554 }
 0x12f   :  { %1296 = vmatmul.mubr.f32.vlgmr.msra.gmra.mxu0 %v1555_v9 }
 0x130   :  { %1334 = vmatpush3.msra.mxu0 %v1746_v12  ;;  %1365 = vmatprep.mubr.msk.f32.mxu0 %vm1687_vm1, %v1686_v14 }
 0x131   :  { %1335 = vmatprep.subr.mxu0 %v1686_v14 }
 0x132   :  { %1336 = vmatpush3.msra.mxu0 %v1750_v16 }
 0x133   :  { %1337 = vmatprep.subr.mxu0 %v1686_v14 }
 0x134   :  { %1338 = vmatpush3.msra.mxu0 %v1754_v19 }
 0x135   :  { %1339 = vmatprep.subr.mxu0 %v1686_v14 }
 0x136   :  { %1340 = vmatpush3.msra.mxu0 %v1758_v22 }
 0x137   :  { %1341 = vmatprep.subr.mxu0 %v1686_v14 }
 0x138   :  { %1342 = vmatpush3.msra.mxu0 %v1762_v25 }
 0x139   :  { %1343 = vmatprep.subr.mxu0 %v1686_v14 }
 0x13a   :  { %1344 = vmatpush3.msra.mxu0 %v1766_v28 }
 0x13b   :  { %1345 = vmatprep.subr.mxu0 %v1686_v14 }
 0x13c   :  { %1346 = vmatpush3.msra.mxu0 %v1770_v31 }
 0x13d   :  { %1347 = vmatprep.subr.mxu0 %v1686_v14 }
 0x13e   :  { %1348 = vmatpush3.msra.mxu0 %v1774_v34 }
 0x13f   :  { %1349 = vmatprep.subr.mxu0 %v1686_v14 }
 0x140   :  { %1350 = vmatpush3.msra.mxu0 %v1778_v37 }
 0x141   :  { %1351 = vmatprep.subr.mxu0 %v1686_v14 }
 0x142   :  { %1352 = vmatpush3.msra.mxu0 %v1782_v40 }
 0x143   :  { %1353 = vmatprep.subr.mxu0 %v1686_v14 }
 0x144   :  { %1354 = vmatpush3.msra.mxu0 %v1786_v43 }
 0x145   :  { %1355 = vmatprep.subr.mxu0 %v1686_v14 }
 0x146   :  { %1356 = vmatpush3.msra.mxu0 %v1790_v46 }
 0x147   :  { %1357 = vmatprep.subr.mxu0 %v1686_v14 }
 0x148   :  { %1358 = vmatpush3.msra.mxu0 %v1794_v50 }
 0x149   :  { %1359 = vmatprep.subr.mxu0 %v1686_v14 }
 0x14a   :  { %1360 = vmatpush3.msra.mxu0 %v1798_v52 }
 0x14b   :  { %1361 = vmatprep.subr.mxu0 %v1686_v14 }
 0x14c   :  { %1362 = vmatpush3.msra.mxu0 %v1802_v54 }
 0x14d   :  { %1363 = vmatprep.subr.mxu0 %v1686_v14 }
 0x14e   :  { %1364 = vmatpush3.msra.mxu0 %v1806_v56 }
 0x14f   :  { %1403 = vmatprep.subr.mxu0 %v1686_v14 }
 0x1ef   :  { %v437_v10 = vpop.f32.mrf.mxu0 }
 0x1f0   :  { %v442_v11 = vrot.slane %v437_v10, 6 }
 0x1f1   :  { %v1297_v13 = vpop.f32.mrf.mxu0 }
 0x1f2   :  { %v444_v15 = vadd.f32 %v442_v11, %v1887_v3 }
 0x1f4   :  { %1556 = vtanh.f32 %v444_v15 }
 0x201   :  { %v1557_v17 = vpop.eup %1556 }
 0x202   :  { %v447_v18 = vrot.slane %v1557_v17, 2 }
 0x204   :  { %1331 = vmatmul.mubr.f32.vlgmr.msra.gmra.mxu1 %v447_v18 }
 0x205   :  { %1369 = vmatpush3.msra.mxu1 %v1746_v12  ;;  %1400 = vmatprep.mubr.msk.f32.mxu1 %vm1687_vm1, %v1686_v14 }
 0x206   :  { %1370 = vmatprep.subr.mxu1 %v1686_v14 }
 0x207   :  { %1371 = vmatpush3.msra.mxu1 %v1750_v16 }
 0x208   :  { %1372 = vmatprep.subr.mxu1 %v1686_v14 }
 0x209   :  { %1373 = vmatpush3.msra.mxu1 %v1754_v19 }
 0x20a   :  { %1374 = vmatprep.subr.mxu1 %v1686_v14 }
 0x20b   :  { %1375 = vmatpush3.msra.mxu1 %v1758_v22 }
 0x20c   :  { %1376 = vmatprep.subr.mxu1 %v1686_v14 }
 0x20d   :  { %1377 = vmatpush3.msra.mxu1 %v1762_v25 }
 0x20e   :  { %1378 = vmatprep.subr.mxu1 %v1686_v14 }
 0x20f   :  { %1379 = vmatpush3.msra.mxu1 %v1766_v28 }
 0x210   :  { %1380 = vmatprep.subr.mxu1 %v1686_v14 }
 0x211   :  { %1381 = vmatpush3.msra.mxu1 %v1770_v31 }
 0x212   :  { %1382 = vmatprep.subr.mxu1 %v1686_v14 }
 0x213   :  { %1383 = vmatpush3.msra.mxu1 %v1774_v34 }
 0x214   :  { %1384 = vmatprep.subr.mxu1 %v1686_v14 }
 0x215   :  { %1385 = vmatpush3.msra.mxu1 %v1778_v37 }
 0x216   :  { %1386 = vmatprep.subr.mxu1 %v1686_v14 }
 0x217   :  { %1387 = vmatpush3.msra.mxu1 %v1782_v40 }
 0x218   :  { %1388 = vmatprep.subr.mxu1 %v1686_v14 }
 0x219   :  { %1389 = vmatpush3.msra.mxu1 %v1786_v43 }
 0x21a   :  { %1390 = vmatprep.subr.mxu1 %v1686_v14 }
 0x21b   :  { %1391 = vmatpush3.msra.mxu1 %v1790_v46 }
 0x21c   :  { %1392 = vmatprep.subr.mxu1 %v1686_v14 }
 0x21d   :  { %1393 = vmatpush3.msra.mxu1 %v1794_v50 }
 0x21e   :  { %1394 = vmatprep.subr.mxu1 %v1686_v14 }
 0x21f   :  { %1395 = vmatpush3.msra.mxu1 %v1798_v52 }
 0x220   :  { %1396 = vmatprep.subr.mxu1 %v1686_v14 }
 0x221   :  { %1397 = vmatpush3.msra.mxu1 %v1802_v54 }
 0x222   :  { %1398 = vmatprep.subr.mxu1 %v1686_v14 }
 0x223   :  { %1399 = vmatpush3.msra.mxu1 %v1806_v56 }
 0x224   :  { %1438 = vmatprep.subr.mxu1 %v1686_v14 }
 0x2c4   :  { %v515_v20 = vpop.f32.mrf.mxu1 }
 0x2c5   :  { %v520_v21 = vrot.slane %v515_v20, 4 }
 0x2c6   :  { %v1332_v23 = vpop.f32.mrf.mxu1 }
 0x2c7   :  { %v522_v24 = vadd.f32 %v520_v21, %v1887_v3 }
 0x2c9   :  { %1558 = vtanh.f32 %v522_v24 }
 0x2d6   :  { %v1559_v26 = vpop.eup %1558 }
 0x2d7   :  { %v525_v27 = vrot.slane %v1559_v26, 4 }
 0x2d9   :  { %1366 = vmatmul.mubr.f32.vlgmr.msra.gmra.mxu0 %v525_v27 }
 0x2da   :  { %1404 = vmatpush3.msra.mxu0 %v1746_v12  ;;  %1435 = vmatprep.mubr.msk.f32.mxu0 %vm1687_vm1, %v1686_v14 }
 0x2db   :  { %1405 = vmatprep.subr.mxu0 %v1686_v14 }
 0x2dc   :  { %1406 = vmatpush3.msra.mxu0 %v1750_v16 }
 0x2dd   :  { %1407 = vmatprep.subr.mxu0 %v1686_v14 }
 0x2de   :  { %1408 = vmatpush3.msra.mxu0 %v1754_v19 }
 0x2df   :  { %1409 = vmatprep.subr.mxu0 %v1686_v14 }
 0x2e0   :  { %1410 = vmatpush3.msra.mxu0 %v1758_v22 }
 0x2e1   :  { %1411 = vmatprep.subr.mxu0 %v1686_v14 }
 0x2e2   :  { %1412 = vmatpush3.msra.mxu0 %v1762_v25 }
 0x2e3   :  { %1413 = vmatprep.subr.mxu0 %v1686_v14 }
 0x2e4   :  { %1414 = vmatpush3.msra.mxu0 %v1766_v28 }
 0x2e5   :  { %1415 = vmatprep.subr.mxu0 %v1686_v14 }
 0x2e6   :  { %1416 = vmatpush3.msra.mxu0 %v1770_v31 }
 0x2e7   :  { %1417 = vmatprep.subr.mxu0 %v1686_v14 }
 0x2e8   :  { %1418 = vmatpush3.msra.mxu0 %v1774_v34 }
 0x2e9   :  { %1419 = vmatprep.subr.mxu0 %v1686_v14 }
 0x2ea   :  { %1420 = vmatpush3.msra.mxu0 %v1778_v37 }
 0x2eb   :  { %1421 = vmatprep.subr.mxu0 %v1686_v14 }
 0x2ec   :  { %1422 = vmatpush3.msra.mxu0 %v1782_v40 }
 0x2ed   :  { %1423 = vmatprep.subr.mxu0 %v1686_v14 }
 0x2ee   :  { %1424 = vmatpush3.msra.mxu0 %v1786_v43 }
 0x2ef   :  { %1425 = vmatprep.subr.mxu0 %v1686_v14 }
 0x2f0   :  { %1426 = vmatpush3.msra.mxu0 %v1790_v46 }
 0x2f1   :  { %1427 = vmatprep.subr.mxu0 %v1686_v14 }
 0x2f2   :  { %1428 = vmatpush3.msra.mxu0 %v1794_v50 }
 0x2f3   :  { %1429 = vmatprep.subr.mxu0 %v1686_v14 }
 0x2f4   :  { %1430 = vmatpush3.msra.mxu0 %v1798_v52 }
 0x2f5   :  { %1431 = vmatprep.subr.mxu0 %v1686_v14 }
 0x2f6   :  { %1432 = vmatpush3.msra.mxu0 %v1802_v54 }
 0x2f7   :  { %1433 = vmatprep.subr.mxu0 %v1686_v14 }
 0x2f8   :  { %1434 = vmatpush3.msra.mxu0 %v1806_v56 }
 0x2f9   :  { %1473 = vmatprep.subr.mxu0 %v1686_v14 }
 0x399   :  { %v593_v29 = vpop.f32.mrf.mxu0 }
 0x39a   :  { %v598_v30 = vrot.slane %v593_v29, 2 }
 0x39b   :  { %v1367_v32 = vpop.f32.mrf.mxu0 }
 0x39c   :  { %v600_v33 = vadd.f32 %v598_v30, %v1887_v3  ;;  %v1025_v3 = vld [vmem:[%s2096_s5] ss:$0 sm:$0xff] }
 0x39e   :  { %1560 = vtanh.f32 %v600_v33 }
 0x3ab   :  { %v1561_v35 = vpop.eup %1560 }
 0x3ac   :  { %v603_v36 = vrot.slane %v1561_v35, 6 }
 0x3ae   :  { %1401 = vmatmul.mubr.f32.vlgmr.msra.gmra.mxu1 %v603_v36 }
 0x3af   :  { %1439 = vmatpush3.msra.mxu1 %v1746_v12  ;;  %1470 = vmatprep.mubr.msk.f32.mxu1 %vm1687_vm1, %v1686_v14 }
 0x3b0   :  { %1440 = vmatprep.subr.mxu1 %v1686_v14 }
 0x3b1   :  { %1441 = vmatpush3.msra.mxu1 %v1750_v16 }
 0x3b2   :  { %1442 = vmatprep.subr.mxu1 %v1686_v14 }
 0x3b3   :  { %1443 = vmatpush3.msra.mxu1 %v1754_v19 }
 0x3b4   :  { %1444 = vmatprep.subr.mxu1 %v1686_v14 }
 0x3b5   :  { %1445 = vmatpush3.msra.mxu1 %v1758_v22 }
 0x3b6   :  { %1446 = vmatprep.subr.mxu1 %v1686_v14 }
 0x3b7   :  { %1447 = vmatpush3.msra.mxu1 %v1762_v25 }
 0x3b8   :  { %1448 = vmatprep.subr.mxu1 %v1686_v14 }
 0x3b9   :  { %1449 = vmatpush3.msra.mxu1 %v1766_v28 }
 0x3ba   :  { %1450 = vmatprep.subr.mxu1 %v1686_v14 }
 0x3bb   :  { %1451 = vmatpush3.msra.mxu1 %v1770_v31 }
 0x3bc   :  { %1452 = vmatprep.subr.mxu1 %v1686_v14 }
 0x3bd   :  { %1453 = vmatpush3.msra.mxu1 %v1774_v34 }
 0x3be   :  { %1454 = vmatprep.subr.mxu1 %v1686_v14 }
 0x3bf   :  { %1455 = vmatpush3.msra.mxu1 %v1778_v37 }
 0x3c0   :  { %1456 = vmatprep.subr.mxu1 %v1686_v14 }
 0x3c1   :  { %1457 = vmatpush3.msra.mxu1 %v1782_v40 }
 0x3c2   :  { %1458 = vmatprep.subr.mxu1 %v1686_v14 }
 0x3c3   :  { %1459 = vmatpush3.msra.mxu1 %v1786_v43 }
 0x3c4   :  { %1460 = vmatprep.subr.mxu1 %v1686_v14 }
 0x3c5   :  { %1461 = vmatpush3.msra.mxu1 %v1790_v46 }
 0x3c6   :  { %1462 = vmatprep.subr.mxu1 %v1686_v14 }
 0x3c7   :  { %1463 = vmatpush3.msra.mxu1 %v1794_v50 }
 0x3c8   :  { %1464 = vmatprep.subr.mxu1 %v1686_v14 }
 0x3c9   :  { %1465 = vmatpush3.msra.mxu1 %v1798_v52 }
 0x3ca   :  { %1466 = vmatprep.subr.mxu1 %v1686_v14 }
 0x3cb   :  { %1467 = vmatpush3.msra.mxu1 %v1802_v54 }
 0x3cc   :  { %1468 = vmatprep.subr.mxu1 %v1686_v14 }
 0x3cd   :  { %1469 = vmatpush3.msra.mxu1 %v1806_v56 }
 0x3ce   :  { %1508 = vmatprep.subr.mxu1 %v1686_v14 }
 0x46e   :  { %v671_v38 = vpop.f32.mrf.mxu1 }
 0x46f   :  { %v675_v39 = vadd.f32 %v671_v38, %v1890_v8 }
 0x470   :  { %v1402_v41 = vpop.f32.mrf.mxu1 }
 0x471   :  { %1562 = vtanh.f32 %v675_v39 }
 0x47e   :  { %v1563_v42 = vpop.eup %1562 }
 0x47f   :  { %1436 = vmatmul.mubr.f32.vlgmr.msra.gmra.mxu0 %v1563_v42 }
 0x480   :  { %1474 = vmatpush3.msra.mxu0 %v1746_v12  ;;  %1505 = vmatprep.mubr.msk.f32.mxu0 %vm1687_vm1, %v1686_v14 }
 0x481   :  { %1475 = vmatprep.subr.mxu0 %v1686_v14 }
 0x482   :  { %1476 = vmatpush3.msra.mxu0 %v1750_v16 }
 0x483   :  { %1477 = vmatprep.subr.mxu0 %v1686_v14 }
 0x484   :  { %1478 = vmatpush3.msra.mxu0 %v1754_v19 }
 0x485   :  { %1479 = vmatprep.subr.mxu0 %v1686_v14 }
 0x486   :  { %1480 = vmatpush3.msra.mxu0 %v1758_v22 }
 0x487   :  { %1481 = vmatprep.subr.mxu0 %v1686_v14 }
 0x488   :  { %1482 = vmatpush3.msra.mxu0 %v1762_v25 }
 0x489   :  { %1483 = vmatprep.subr.mxu0 %v1686_v14 }
 0x48a   :  { %1484 = vmatpush3.msra.mxu0 %v1766_v28 }
 0x48b   :  { %1485 = vmatprep.subr.mxu0 %v1686_v14 }
 0x48c   :  { %1486 = vmatpush3.msra.mxu0 %v1770_v31  ;;  %v923_v31 = vld [vmem:[#allocation8 + $0x78] sm:$0xff] }
 0x48d   :  { %1487 = vmatprep.subr.mxu0 %v1686_v14 }
 0x48e   :  { %1488 = vmatpush3.msra.mxu0 %v1774_v34  ;;  %v922_v34 = vld [vmem:[#allocation8 + $0x70] sm:$0xff] }
 0x48f   :  { %1489 = vmatprep.subr.mxu0 %v1686_v14 }
 0x490   :  { %1490 = vmatpush3.msra.mxu0 %v1778_v37  ;;  %v921_v37 = vld [vmem:[#allocation8 + $0x68] sm:$0xff] }
 0x491   :  { %1491 = vmatprep.subr.mxu0 %v1686_v14 }
 0x492   :  { %1492 = vmatpush3.msra.mxu0 %v1782_v40  ;;  %v920_v40 = vld [vmem:[#allocation8 + $0x60] sm:$0xff] }
 0x493   :  { %1493 = vmatprep.subr.mxu0 %v1686_v14 }
 0x494   :  { %1494 = vmatpush3.msra.mxu0 %v1786_v43  ;;  %v919_v43 = vld [vmem:[#allocation8 + $0x58] sm:$0xff] }
 0x495   :  { %1495 = vmatprep.subr.mxu0 %v1686_v14 }
 0x496   :  { %1496 = vmatpush3.msra.mxu0 %v1790_v46 }
 0x497   :  { %1497 = vmatprep.subr.mxu0 %v1686_v14 }
 0x498   :  { %1498 = vmatpush3.msra.mxu0 %v1794_v50  ;;  %v918_v50 = vld [vmem:[#allocation8 + $0x50] sm:$0xff] }
 0x499   :  { %1499 = vmatprep.subr.mxu0 %v1686_v14 }
 0x49a   :  { %1500 = vmatpush3.msra.mxu0 %v1798_v52  ;;  %v916_v52 = vld [vmem:[#allocation8 + $0x40] sm:$0xff] }
 0x49b   :  { %1501 = vmatprep.subr.mxu0 %v1686_v14 }
 0x49c   :  { %1502 = vmatpush3.msra.mxu0 %v1802_v54  ;;  %v914_v54 = vld [vmem:[#allocation8 + $0x30] sm:$0xff] }
 0x49d   :  { %1503 = vmatprep.subr.mxu0 %v1686_v14 }
 0x49e   :  { %1504 = vmatpush3.msra.mxu0 %v1806_v56  ;;  %v912_v56 = vld [vmem:[#allocation8 + $0x20] sm:$0xff] }
 0x53f   :  { %v743_v12 = vpop.f32.mrf.mxu0 }
 0x540   :  { %v748_v16 = vrot.slane %v743_v12, 6 }
 0x541   :  { %v1437_v19 = vpop.f32.mrf.mxu0 }
 0x542   :  { %v750_v22 = vadd.f32 %v748_v16, %v1890_v8 }
 0x544   :  { %1564 = vtanh.f32 %v750_v22 }
 0x551   :  { %v1565_v25 = vpop.eup %1564 }
 0x552   :  { %v753_v28 = vrot.slane %v1565_v25, 2 }
 0x554   :  { %1471 = vmatmul.mubr.f32.vlgmr.msra.gmra.mxu1 %v753_v28 }
 0x555   :  { %1540 = vmatprep.mubr.msk.f32.mxu1 %vm1687_vm1, %v1686_v14  ;;  %1509 = vmatpush3.msra.mxu1 %v923_v31 }
 0x556   :  { %1510 = vmatprep.subr.mxu1 %v1686_v14 }
 0x557   :  { %1511 = vmatpush3.msra.mxu1 %v922_v34 }
 0x558   :  { %1512 = vmatprep.subr.mxu1 %v1686_v14 }
 0x559   :  { %1513 = vmatpush3.msra.mxu1 %v921_v37 }
 0x55a   :  { %1514 = vmatprep.subr.mxu1 %v1686_v14 }
 0x55b   :  { %1515 = vmatpush3.msra.mxu1 %v920_v40 }
 0x55c   :  { %1516 = vmatprep.subr.mxu1 %v1686_v14 }
 0x55d   :  { %1517 = vmatpush3.msra.mxu1 %v919_v43 }
 0x55e   :  { %1518 = vmatprep.subr.mxu1 %v1686_v14 }
 0x55f   :  { %1519 = vmatpush3.msra.mxu1 %v918_v50 }
 0x560   :  { %1520 = vmatprep.subr.mxu1 %v1686_v14 }
 0x561   :  { %1521 = vmatpush3.msra.mxu1 %v917_v51 }
 0x562   :  { %1522 = vmatprep.subr.mxu1 %v1686_v14 }
 0x563   :  { %1523 = vmatpush3.msra.mxu1 %v916_v52 }
 0x564   :  { %1524 = vmatprep.subr.mxu1 %v1686_v14 }
 0x565   :  { %1525 = vmatpush3.msra.mxu1 %v915_v53 }
 0x566   :  { %1526 = vmatprep.subr.mxu1 %v1686_v14 }
 0x567   :  { %1527 = vmatpush3.msra.mxu1 %v914_v54 }
 0x568   :  { %1528 = vmatprep.subr.mxu1 %v1686_v14 }
 0x569   :  { %1529 = vmatpush3.msra.mxu1 %v913_v55 }
 0x56a   :  { %1530 = vmatprep.subr.mxu1 %v1686_v14 }
 0x56b   :  { %1531 = vmatpush3.msra.mxu1 %v912_v56 }
 0x56c   :  { %1532 = vmatprep.subr.mxu1 %v1686_v14 }
 0x56d   :  { %1533 = vmatpush3.msra.mxu1 %v911_v57 }
 0x56e   :  { %1534 = vmatprep.subr.mxu1 %v1686_v14 }
 0x56f   :  { %1535 = vmatpush3.msra.mxu1 %v910_v58 }
 0x570   :  { %1536 = vmatprep.subr.mxu1 %v1686_v14 }
 0x571   :  { %1537 = vmatpush3.msra.mxu1 %v909_v59 }
 0x572   :  { %1538 = vmatprep.subr.mxu1 %v1686_v14 }
 0x573   :  { %1539 = vmatpush3.msra.mxu1 %v908_v60 }
 0x614   :  { %v821_v44 = vpop.f32.mrf.mxu1 }
 0x615   :  { %v826_v45 = vrot.slane %v821_v44, 4 }
 0x616   :  { %v1472_v46 = vpop.f32.mrf.mxu1 }
 0x617   :  { %v828_v47 = vadd.f32 %v826_v45, %v1890_v8 }
 0x619   :  { %1566 = vtanh.f32 %v828_v47 }
 0x626   :  { %v1567_v48 = vpop.eup %1566 }
 0x627   :  { %v831_v49 = vrot.slane %v1567_v48, 4 }
 0x629   :  { %1506 = vmatmul.mubr.f32.vlgmr.msra.gmra.mxu0 %v831_v49 }
 0x6e9   :  { %v899_v61 = vpop.f32.mrf.mxu0 }
 0x6ea   :  { %v904_v62 = vrot.slane %v899_v61, 2 }
 0x6eb   :  { %v1507_v63 = vpop.f32.mrf.mxu0 }
 0x6ec   :  { %v906_v0 = vadd.f32 %v904_v62, %v1890_v8 }
 0x6ee   :  { %1568 = vtanh.f32 %v906_v0 }
 0x6fb   :  { %v1569_v1 = vpop.eup %1568 }
 0x6fc   :  { %v932_v2 = vrot.slane %v1569_v1, 6 }
 0x6fe   :  { %1541 = vmatmul.mubr.f32.vlgmr.msra.gmra.mxu1 %v932_v2 }
 0x7be   :  { %v1000_v4 = vpop.f32.mrf.mxu1 }
 0x7bf   :  { %v1001_v5 = vadd.f32 %v1025_v3, %v1000_v4 }
 0x7c0   :  { %v1542_v14 = vpop.f32.mrf.mxu1 }
 0x7c1   :  { %1004 = vst [vmem:[#allocation10] sm:$0x3] %v1001_v5 }
 0x7c2   :  { %1661 = shalt.err (!%p1658_p10)
}
 0x7c3   :  { %1014 = dma.vmem_to_hbm [thread:$0]  %s1012_s21, 32, %s2097_s6, [#allocation4]  }
 0x7c4   :  { %1676 = dma.done.wait [#allocation4], 32  }
 0x7c5   :  { %1677 = vsyncadd [#allocation4], 4294967264 }
 0x7c6   :  { %1018 = vsyncpa [#allocation3], 1 }
 0x7c7   :  { %1019 = vsyncpa [#allocation6], 1 }
 0x7c8   :  { %1020 = vsyncpa [#allocation9], 1 }
 0x7c9   :  { %1021 = vsyncpa [#allocation4], 1 }

</bundles_post_ra>
